<compile_context>
chip_gen: v5e
topology: v5e:2x2
jax: 0.10.0
libtpu: 0.0.40
codegen_flags: <defaults>
</compile_context>

<pallas_src>
import jax
import jax.numpy as jnp
from jax.experimental import pallas as pl
from jax.experimental.pallas import tpu as pltpu


# ----------------------------- config ---------------------------------------
VOCAB_SIZE = 64
HIDDEN_SIZE = 32
MAX_POSITION_EMBEDDINGS = 16
TYPE_VOCAB_SIZE = 2
PAD_TOKEN_ID = 0
LAYER_NORM_EPS = 1e-12
MXU_DIM = 128  # packed-table row count is padded up to a multiple of this


# ----------------------------- kernel ---------------------------------------
def _kbert_embeddings_kernel(
    ids_ref,     # (N, 4) int32, VMEM : [word, pos, soft_pos, tok_type] ids with
                 #                      per-table row offsets pre-added
    table_ref,   # (R, H) f32, VMEM   : packed embedding table (R = 128 here)
    ln_ref,      # (2, H) f32, VMEM   : row 0 = gamma, row 1 = beta
    out_ref,     # (N, H) f32, VMEM
):
    ids = ids_ref[...]                       # (N, 4)
    table = table_ref[...]                   # (R, H)
    N = ids.shape[0]
    R = table.shape[0]

    # Multi-hot selector: one (N, R) matrix with a 1 at each of the 4 packed
    # row indices per token.  Offsets make the 4 hits land in disjoint column
    # ranges, so the subsequent matmul computes the SUM of the 4 embeddings.
    cols = jax.lax.broadcasted_iota(jnp.int32, (N, R), 1)
    multi_hot_i32 = (
        (ids[:, 0:1] == cols).astype(jnp.int32)
        + (ids[:, 1:2] == cols).astype(jnp.int32)
        + (ids[:, 2:3] == cols).astype(jnp.int32)
        + (ids[:, 3:4] == cols).astype(jnp.int32)
    )
    multi_hot = multi_hot_i32.astype(jnp.float32)          # single cast to f32

    # One MXU matmul: (N, 128) @ (128, H) -> summed embeddings.
    emb = jnp.dot(multi_hot, table, preferred_element_type=jnp.float32)

    # LayerNorm over the hidden axis (biased variance, matching nn.LayerNorm).
    mean = jnp.mean(emb, axis=-1, keepdims=True)
    centered = emb - mean
    var = jnp.mean(centered * centered, axis=-1, keepdims=True)
    normed = centered * jax.lax.rsqrt(var + LAYER_NORM_EPS)

    gamma = ln_ref[0:1, :]                   # (1, H)
    beta = ln_ref[1:2, :]                    # (1, H)

    # Dropout: identity in eval mode.
    out_ref[...] = normed * gamma + beta


# ----------------------------- wrapper ---------------------------------------
def kbert_embeddings(params, input_ids, token_type_ids=None, position_ids=None,
                     soft_position_ids=None, past_key_values_length=0):
    # TODO(synk): the `inputs_embeds` entry point of the PyTorch module
    # (precomputed word embeddings instead of input_ids) is not implemented.
    B, S = input_ids.shape
    H = params["word_embeddings"].shape[1]
    V = params["word_embeddings"].shape[0]
    P = params["position_embeddings"].shape[0]
    T = params["token_type_embeddings"].shape[0]

    if position_ids is None:
        position_ids = jnp.broadcast_to(
            jnp.arange(past_key_values_length, past_key_values_length + S,
                       dtype=jnp.int32)[None, :], (B, S))
    if soft_position_ids is None:
        soft_position_ids = position_ids
    if token_type_ids is None:
        token_type_ids = jnp.zeros((B, S), dtype=jnp.int32)

    N = B * S

    # --- pack the 4 tables into one (R, H) table padded to a 128-multiple ---
    packed = jnp.concatenate(
        [params["word_embeddings"],
         params["position_embeddings"],
         params["soft_position_embeddings"],
         params["token_type_embeddings"]], axis=0)          # (V+2P+T, H)
    total_rows = V + 2 * P + T
    R = ((total_rows + MXU_DIM - 1) // MXU_DIM) * MXU_DIM
    packed = jnp.pad(packed, ((0, R - total_rows), (0, 0)))

    # --- pack the 4 id tensors into one (N, 4) array with row offsets ---
    ids_packed = jnp.stack(
        [input_ids.reshape(-1).astype(jnp.int32),
         position_ids.reshape(-1).astype(jnp.int32) + V,
         soft_position_ids.reshape(-1).astype(jnp.int32) + V + P,
         token_type_ids.reshape(-1).astype(jnp.int32) + V + 2 * P],
        axis=1)                                             # (N, 4) int32

    # --- pack LayerNorm params into one (2, H) array ---
    ln_params = jnp.stack(
        [params["ln_gamma"].astype(jnp.float32),
         params["ln_beta"].astype(jnp.float32)], axis=0)    # (2, H)

    vmem = pl.BlockSpec(memory_space=pltpu.MemorySpace.VMEM)

    out_flat = pl.pallas_call(
        _kbert_embeddings_kernel,
        out_shape=jax.ShapeDtypeStruct((N, H), jnp.float32),
        in_specs=[vmem, vmem, vmem],
        out_specs=vmem,
    )(ids_packed, packed, ln_params)

    # Un-flatten in the wrapper (free XLA layout plumbing, not in-kernel work).
    return out_flat.reshape(B, S, H)


# ----------------------------- reference -------------------------------------
def kbert_embeddings_ref(params, input_ids, token_type_ids, position_ids,
                         soft_position_ids):
    e = (params["word_embeddings"][input_ids]
         + params["token_type_embeddings"][token_type_ids]
         + params["position_embeddings"][position_ids]
         + params["soft_position_embeddings"][soft_position_ids])
    mean = jnp.mean(e, axis=-1, keepdims=True)
    var = jnp.mean((e - mean) ** 2, axis=-1, keepdims=True)
    normed = (e - mean) / jnp.sqrt(var + LAYER_NORM_EPS)
    return normed * params["ln_gamma"] + params["ln_beta"]


# ----------------------------- main -------------------------------------------
if __name__ == "__main__":
    key = jax.random.PRNGKey(0)
    k_w, k_p, k_s, k_t, k_ids, k_tt = jax.random.split(key, 6)

    word_emb = jax.random.normal(k_w, (VOCAB_SIZE, HIDDEN_SIZE), jnp.float32) * 0.02
    # padding_idx row is zero-initialized in nn.Embedding
    word_emb = word_emb.at[PAD_TOKEN_ID].set(0.0)
    pos_emb = jax.random.normal(
        k_p, (MAX_POSITION_EMBEDDINGS, HIDDEN_SIZE), jnp.float32) * 0.02
    soft_pos_emb = jax.random.normal(
        k_s, (MAX_POSITION_EMBEDDINGS, HIDDEN_SIZE), jnp.float32) * 0.02
    tok_type_emb = jax.random.normal(
        k_t, (TYPE_VOCAB_SIZE, HIDDEN_SIZE), jnp.float32) * 0.02

    params = {
        "word_embeddings": word_emb,
        "position_embeddings": pos_emb,
        "soft_position_embeddings": soft_pos_emb,
        "token_type_embeddings": tok_type_emb,
        "ln_gamma": jnp.ones((HIDDEN_SIZE,), jnp.float32),
        "ln_beta": jnp.zeros((HIDDEN_SIZE,), jnp.float32),
    }

    B, S = 2, 8
    input_ids = jax.random.randint(k_ids, (B, S), 0, VOCAB_SIZE, dtype=jnp.int32)
    token_type_ids = jax.random.randint(k_tt, (B, S), 0, TYPE_VOCAB_SIZE,
                                        dtype=jnp.int32)
    position_ids = jnp.broadcast_to(jnp.arange(S, dtype=jnp.int32)[None, :], (B, S))
    soft_position_ids = position_ids

    out = kbert_embeddings(params, input_ids, token_type_ids, position_ids,
                           soft_position_ids)
    out = jax.block_until_ready(out)

    ref = kbert_embeddings_ref(params, input_ids, token_type_ids, position_ids,
                               soft_position_ids)
    assert out.shape == (B, S, HIDDEN_SIZE)
    assert jnp.allclose(out, ref, atol=1e-4, rtol=1e-4)
    print("KERNEL_OK")
</pallas_src>

<mosaic_0001>
module attributes {stable_mosaic.version = 11 : i64} {
  func.func @_kbert_embeddings_kernel(%arg0: memref<16x4xi32, #tpu.memory_space<vmem>>, %arg1: memref<128x32xf32, #tpu.memory_space<vmem>>, %arg2: memref<2x32xf32, #tpu.memory_space<vmem>>, %arg3: memref<16x32xf32, #tpu.memory_space<vmem>>) attributes {dimension_semantics = [], scalar_prefetch = 0 : i64, scratch_operands = 0 : i64, tpu.core_type = #tpu.core_type<tc>} {
    %c0 = arith.constant 0 : index
    %c0_0 = arith.constant 0 : index
    %0 = vector.load %arg0[%c0, %c0_0] : memref<16x4xi32, #tpu.memory_space<vmem>>, vector<16x4xi32>
    %c0_1 = arith.constant 0 : index
    %c0_2 = arith.constant 0 : index
    %1 = vector.load %arg1[%c0_1, %c0_2] : memref<128x32xf32, #tpu.memory_space<vmem>>, vector<128x32xf32>
    %2 = tpu.iota {dimensions = array<i32: 1>} : vector<16x128xi32>
    %3 = vector.extract_strided_slice %0 {offsets = [0, 0], sizes = [16, 1], strides = [1, 1]} : vector<16x4xi32> to vector<16x1xi32>
    %4 = vector.broadcast %3 : vector<16x1xi32> to vector<16x128xi32>
    %5 = arith.cmpi eq, %4, %2 : vector<16x128xi32>
    %6 = arith.extui %5 : vector<16x128xi1> to vector<16x128xi32>
    %7 = vector.extract_strided_slice %0 {offsets = [0, 1], sizes = [16, 1], strides = [1, 1]} : vector<16x4xi32> to vector<16x1xi32>
    %8 = vector.broadcast %7 : vector<16x1xi32> to vector<16x128xi32>
    %9 = arith.cmpi eq, %8, %2 : vector<16x128xi32>
    %10 = arith.extui %9 : vector<16x128xi1> to vector<16x128xi32>
    %11 = arith.addi %6, %10 : vector<16x128xi32>
    %12 = vector.extract_strided_slice %0 {offsets = [0, 2], sizes = [16, 1], strides = [1, 1]} : vector<16x4xi32> to vector<16x1xi32>
    %13 = vector.broadcast %12 : vector<16x1xi32> to vector<16x128xi32>
    %14 = arith.cmpi eq, %13, %2 : vector<16x128xi32>
    %15 = arith.extui %14 : vector<16x128xi1> to vector<16x128xi32>
    %16 = arith.addi %11, %15 : vector<16x128xi32>
    %17 = vector.extract_strided_slice %0 {offsets = [0, 3], sizes = [16, 1], strides = [1, 1]} : vector<16x4xi32> to vector<16x1xi32>
    %18 = vector.broadcast %17 : vector<16x1xi32> to vector<16x128xi32>
    %19 = arith.cmpi eq, %18, %2 : vector<16x128xi32>
    %20 = arith.extui %19 : vector<16x128xi1> to vector<16x128xi32>
    %21 = arith.addi %16, %20 : vector<16x128xi32>
    %22 = arith.sitofp %21 : vector<16x128xi32> to vector<16x128xf32>
    %cst = arith.constant dense<0.000000e+00> : vector<16x32xf32>
    %23 = tpu.matmul %22, %1, %cst {dimension_numbers = #tpu.dot_dimension_numbers<[1], [0], [0], [1], [0, 0, 1, 1], [], []>} : vector<16x128xf32>, vector<128x32xf32>, vector<16x32xf32> -> vector<16x32xf32>
    %cst_3 = arith.constant dense<0.000000e+00> : vector<16xf32>
    %24 = vector.multi_reduction <add>, %23, %cst_3 [1] : vector<16x32xf32> to vector<16xf32>
    %25 = vector.shape_cast %24 : vector<16xf32> to vector<16x1xf32>
    %cst_4 = arith.constant 3.200000e+01 : f32
    %26 = vector.broadcast %cst_4 : f32 to vector<16x1xf32>
    %27 = arith.divf %25, %26 : vector<16x1xf32>
    %28 = vector.broadcast %27 : vector<16x1xf32> to vector<16x32xf32>
    %29 = arith.subf %23, %28 : vector<16x32xf32>
    %30 = arith.mulf %29, %29 : vector<16x32xf32>
    %cst_5 = arith.constant dense<0.000000e+00> : vector<16xf32>
    %31 = vector.multi_reduction <add>, %30, %cst_5 [1] : vector<16x32xf32> to vector<16xf32>
    %32 = vector.shape_cast %31 : vector<16xf32> to vector<16x1xf32>
    %cst_6 = arith.constant 3.200000e+01 : f32
    %33 = vector.broadcast %cst_6 : f32 to vector<16x1xf32>
    %34 = arith.divf %32, %33 : vector<16x1xf32>
    %cst_7 = arith.constant 9.99999996E-13 : f32
    %35 = vector.broadcast %cst_7 : f32 to vector<16x1xf32>
    %36 = arith.addf %34, %35 : vector<16x1xf32>
    %37 = math.rsqrt %36 : vector<16x1xf32>
    %38 = vector.broadcast %37 : vector<16x1xf32> to vector<16x32xf32>
    %39 = arith.mulf %29, %38 : vector<16x32xf32>
    %c0_8 = arith.constant 0 : index
    %c0_9 = arith.constant 0 : index
    %40 = vector.load %arg2[%c0_8, %c0_9] : memref<2x32xf32, #tpu.memory_space<vmem>>, vector<1x32xf32>
    %c1 = arith.constant 1 : index
    %c0_10 = arith.constant 0 : index
    %41 = vector.load %arg2[%c1, %c0_10] : memref<2x32xf32, #tpu.memory_space<vmem>>, vector<1x32xf32>
    %42 = vector.broadcast %40 : vector<1x32xf32> to vector<16x32xf32>
    %43 = arith.mulf %39, %42 : vector<16x32xf32>
    %44 = vector.broadcast %41 : vector<1x32xf32> to vector<16x32xf32>
    %45 = arith.addf %43, %44 : vector<16x32xf32>
    %c0_11 = arith.constant 0 : index
    %c0_12 = arith.constant 0 : index
    %46 = vector.load %arg3[%c0_11, %c0_12] : memref<16x32xf32, #tpu.memory_space<vmem>>, vector<16x32xf32>
    tpu.vector_store %arg3[%c0_11, %c0_12], %45 {strides = array<i32>} : memref<16x32xf32, #tpu.memory_space<vmem>>, vector<16x32xf32>,
    return
  }
}

</mosaic_0001>

<bundles_post_ra>
// kernel: tpu_custom_call.1
= control target key start
LH: loop header
LB: loop body
LE: loop exit
PB: predicated region body
PF: predicated region fallthrough
CT: control target
= control target key end

     0   :  { %v249_v1 = vmov 1   ;;  %v250_v2 = vmov 0   ;;  %s355_s0 = inlined_call_operand.vmem [shape: s32[16,4], index: 0, kind: input, shape index: {}]   ;;  %s356_s1 = inlined_call_operand.vmem [shape: f32[128,32], index: 1, kind: input, shape index: {}]   ;;  %s357_s2 = inlined_call_operand.vmem [shape: f32[2,32], index: 2, kind: input, shape index: {}]   ;;  %s358_s3 = inlined_call_operand.hbm [shape: f32[16,32], index: 3, kind: output, shape index: {}]  }
   0x1   :  { %v15_v0 = vld [vmem:[%s355_s0] sm:$0xff]  ;;  %211 = vset.pattern.permute.xlu1 %v249_v1  ;;  %210 = vset.pattern.permute.xlu0 %v250_v2  ;;  %v32_v3 = vld [vmem:[%s356_s1 + $0x78] sm:$0xff]  ;;  %v31_v4 = vld [vmem:[%s356_s1 + $0x70] sm:$0xff] }
   0x2   :  { %46 = vperm.xlu1 %211, %v15_v0   ;;  %36 = vperm.xlu0 %210, %v15_v0  }
   0x3   :  { %8 = vsyncpa [#allocation3], 0  ;;  %v251_v5 = vmov 2   ;;  %83 = vmatpush.msra.mxu0 %v32_v3  ;;  %186 = vmatpush.msra.mxu1 %v32_v3  ;;  %v30_v6 = vld [vmem:[%s356_s1 + $0x68] sm:$0xff]  ;;  %v29_v7 = vld [vmem:[%s356_s1 + $0x60] sm:$0xff]  ;;  %v252_v9 = vmov 3   ;;  %v33_v22 = vlaneseq }
   0x4   :  { %212 = vset.pattern.permute.xlu2 %v251_v5  ;;  %v16_v8 = vld [vmem:[%s355_s0 + $0x8] sm:$0xff]  ;;  %v28_v10 = vld [vmem:[%s356_s1 + $0x58] sm:$0xff]  ;;  %v27_v11 = vld [vmem:[%s356_s1 + $0x50] sm:$0xff]  ;;  %vm106_vm8 = vcmask 261120   ;;  %v253_v52 = vmov 32.0   ;;  %s254_s23 = smov [#allocation2]  }
   0x5   :  { %58 = vperm.xlu2 %212, %v15_v0   ;;  %84 = vmatpush.msra.mxu0 %v31_v4  ;;  %v26_v12 = vld [vmem:[%s356_s1 + $0x48] sm:$0xff]  ;;  %v25_v13 = vld [vmem:[%s356_s1 + $0x40] sm:$0xff]  ;;  %v24_v14 = vld [vmem:[%s356_s1 + $0x38] sm:$0xff]  ;;  %v34_v26 = vand.u32 127, %v33_v22  ;;  %217 = vrcp.f32 %v253_v52  ;;  %s172_s24 = sshll.u32 %s254_s23, 4  ;;  %s174_s0 = sshll.u32 %s358_s3, 4  ;;  %s173_s24 = int_to_ptr.vmem [resolvable:$true] %s172_s24  ;;  %s175_s0 = int_to_ptr.hbm [resolvable:$true] %s174_s0 }
   0x6   :  { %187 = vmatpush.msra.mxu1 %v31_v4  ;;  %v23_v15 = vld [vmem:[%s356_s1 + $0x30] sm:$0xff]  ;;  %v22_v16 = vld [vmem:[%s356_s1 + $0x28] sm:$0xff]  ;;  %v21_v17 = vld [vmem:[%s356_s1 + $0x20] sm:$0xff]  ;;  %s255_s27 = smov 128   ;;  %s256_s28 = smov 8  }
   0x7   :  { %85 = vmatpush.msra.mxu0 %v30_v6  ;;  %v20_v18 = vld [vmem:[%s356_s1 + $0x18] sm:$0xff]  ;;  %v19_v19 = vld [vmem:[%s356_s1 + $0x10] sm:$0xff]  ;;  %v18_v20 = vld [vmem:[%s356_s1 + $0x8] sm:$0xff] }
   0x8   :  { %188 = vmatpush.msra.mxu1 %v30_v6  ;;  %v17_v21 = vld [vmem:[%s356_s1] sm:$0xff] }
   0x9   :  { %86 = vmatpush.msra.mxu0 %v29_v7  ;;  %v215_v22 = vld [vmem:[%s357_s2] ss:$0 sm:$0xff] }
   0xa   :  { %49 = vperm.xlu1 %211, %v16_v8   ;;  %39 = vperm.xlu0 %210, %v16_v8  }
   0xb   :  { %189 = vmatpush.msra.mxu1 %v29_v7  ;;  %87 = vmatpush.msra.mxu0 %v28_v10  ;;  %v218_v53 = vpop.eup %217 }
   0xc   :  { %v114_v54 = vmul.f32 32.0, %v218_v53  ;;  %vm118_vm9 = vweird.f32 %v218_v53 }
   0xd   :  { %61 = vperm.xlu2 %212, %v16_v8   ;;  %190 = vmatpush.msra.mxu1 %v28_v10 }
   0xe   :  { %88 = vmatpush.msra.mxu0 %v27_v11  ;;  %v115_v55 = vsub.f32 1.0, %v114_v54 }
   0xf   :  { %191 = vmatpush.msra.mxu1 %v27_v11 }
  0x10   :  { %89 = vmatpush.msra.mxu0 %v26_v12  ;;  %v116_v56 = vmul.f32 %v218_v53, %v115_v55 }
  0x11   :  { %192 = vmatpush.msra.mxu1 %v26_v12 }
  0x12   :  { %214 = vset.pattern.permute.xlu1 %v252_v9  ;;  %213 = vset.pattern.permute.xlu0 %v252_v9  ;;  %v117_v57 = vadd.f32 %v218_v53, %v116_v56 }
  0x13   :  { %73 = vperm.xlu1 %214, %v16_v8   ;;  %70 = vperm.xlu0 %213, %v15_v0  }
  0x14   :  { %90 = vmatpush.msra.mxu0 %v25_v13  ;;  %193 = vmatpush.msra.mxu1 %v25_v13  ;;  %v119_v58 = vsel %vm118_vm9, %v218_v53, %v117_v57 }
  0x16   :  { %91 = vmatpush.msra.mxu0 %v24_v14  ;;  %194 = vmatpush.msra.mxu1 %v24_v14 }
  0x18   :  { %92 = vmatpush.msra.mxu0 %v23_v15  ;;  %195 = vmatpush.msra.mxu1 %v23_v15 }
  0x1a   :  { %93 = vmatpush.msra.mxu0 %v22_v16  ;;  %196 = vmatpush.msra.mxu1 %v22_v16 }
  0x1c   :  { %94 = vmatpush.msra.mxu0 %v21_v17  ;;  %197 = vmatpush.msra.mxu1 %v21_v17 }
  0x1e   :  { %95 = vmatpush.msra.mxu0 %v20_v18  ;;  %198 = vmatpush.msra.mxu1 %v20_v18 }
  0x20   :  { %96 = vmatpush.msra.mxu0 %v19_v19  ;;  %199 = vmatpush.msra.mxu1 %v19_v19 }
  0x22   :  { %97 = vmatpush.msra.mxu0 %v18_v20  ;;  %200 = vmatpush.msra.mxu1 %v18_v20 }
  0x24   :  { %98 = vmatpush.msra.mxu0 %v17_v21  ;;  %201 = vmatpush.msra.mxu1 %v17_v21 }
  0x5f   :  { %v59_v25 = vpop.permute.xlu2 %58 }
  0x60   :  { %vm63_vm4 = vcmp.eq.s32.totalorder %v59_v25, %v34_v26 }
  0x61   :  { %v65_v36 = vsel %vm63_vm4, 1, %v250_v2 }
  0x67   :  { %v62_v31 = vpop.permute.xlu2 %61 }
  0x68   :  { %vm64_vm5 = vcmp.eq.s32.totalorder %v62_v31, %v34_v26 }
  0x69   :  { %v66_v37 = vsel %vm64_vm5, 1, %v250_v2 }
  0x74   :  { %v47_v23 = vpop.permute.xlu1 %46  ;;  %v37_v24 = vpop.permute.xlu0 %36 }
  0x75   :  { %vm51_vm0 = vcmp.eq.s32.totalorder %v47_v23, %v34_v26  ;;  %vm41_vm1 = vcmp.eq.s32.totalorder %v37_v24, %v34_v26 }
  0x76   :  { %v53_v29 = vsel %vm51_vm0, 1, %v250_v2  ;;  %v43_v30 = vsel %vm41_vm1, 1, %v250_v2 }
  0x77   :  { %v55_v34 = vadd.s32 %v53_v29, %v43_v30 }
  0x79   :  { %v67_v40 = vadd.s32 %v65_v36, %v55_v34 }
  0x7c   :  { %v50_v27 = vpop.permute.xlu1 %49  ;;  %v40_v28 = vpop.permute.xlu0 %39 }
  0x7d   :  { %vm52_vm2 = vcmp.eq.s32.totalorder %v50_v27, %v34_v26  ;;  %vm42_vm3 = vcmp.eq.s32.totalorder %v40_v28, %v34_v26  ;;  %v216_v27 = vld [vmem:[%s357_s2 + $0x1] ss:$0 sm:$0xff] }
  0x7e   :  { %v54_v32 = vsel %vm52_vm2, 1, %v250_v2  ;;  %v44_v33 = vsel %vm42_vm3, 1, %v250_v2 }
  0x7f   :  { %v56_v35 = vadd.s32 %v54_v32, %v44_v33 }
  0x81   :  { %v68_v41 = vadd.s32 %v66_v37, %v56_v35 }
  0x85   :  { %v74_v38 = vpop.permute.xlu1 %73  ;;  %v71_v39 = vpop.permute.xlu0 %70 }
  0x86   :  { %vm76_vm6 = vcmp.eq.s32.totalorder %v74_v38, %v34_v26  ;;  %vm75_vm7 = vcmp.eq.s32.totalorder %v71_v39, %v34_v26 }
  0x87   :  { %v78_v42 = vsel %vm76_vm6, 1, %v250_v2  ;;  %v77_v43 = vsel %vm75_vm7, 1, %v250_v2 }
  0x88   :  { %v79_v44 = vadd.s32 %v77_v43, %v67_v40  ;;  %v80_v45 = vadd.s32 %v78_v42, %v68_v41 }
  0x8a   :  { %v81_v46 = vcvt.s32.f32 %v79_v44  ;;  %v82_v47 = vcvt.s32.f32 %v80_v45 }
  0x8c   :  { %99 = vmatmul.f32.vlgmr.msra.gmra.mxu0 %v81_v46  ;;  %102 = vmatmul.f32.vlgmr.msra.gmra.mxu1 %v82_v47 }
 0x109   :  { %v100_v48 = vpop.f32.mrf.mxu0  ;;  %v103_v49 = vpop.f32.mrf.mxu1 }
 0x10a   :  { %v110_v50 = vsel %vm106_vm8, %v103_v49, 0.0  ;;  %v107_v51 = vsel %vm106_vm8, %v100_v48, 0.0 }
 0x10b   :  { %111 = vadd.xlane.f32.xlu1 %v110_v50  ;;  %108 = vadd.xlane.f32.xlu2 %v107_v51 }
 0x17e   :  { %v112_v59 = vpop.xlane.xlu1 %111  ;;  %v109_v60 = vpop.xlane.xlu2 %108 }
 0x17f   :  { %v121_v61 = vmul.f32 %v119_v58, %v112_v59  ;;  %v120_v62 = vmul.f32 %v119_v58, %v109_v60 }
 0x181   :  { %v123_v63 = vsub.f32 %v103_v49, %v121_v61  ;;  %v122_v0 = vsub.f32 %v100_v48, %v120_v62 }
 0x183   :  { %v125_v1 = vmul.f32 %v123_v63, %v123_v63  ;;  %v124_v2 = vmul.f32 %v122_v0, %v122_v0 }
 0x185   :  { %v129_v3 = vsel %vm106_vm8, %v125_v1, 0.0  ;;  %v126_v4 = vsel %vm106_vm8, %v124_v2, 0.0 }
 0x186   :  { %130 = vadd.xlane.f32.xlu2 %v129_v3  ;;  %127 = vadd.xlane.f32.xlu0 %v126_v4 }
 0x1f9   :  { %v128_v5 = vpop.xlane.xlu0 %127  ;;  %v131_v6 = vpop.xlane.xlu2 %130 }
 0x1fa   :  { %v132_v7 = vmul.f32 %v128_v5, %v119_v58  ;;  %v133_v8 = vmul.f32 %v131_v6, %v119_v58 }
 0x1fc   :  { %v134_v9 = vadd.f32 1e-12, %v132_v7  ;;  %v135_v10 = vadd.f32 1e-12, %v133_v8 }
 0x1fe   :  { %219 = vrsqrt.f32 %v134_v9  ;;  %vm142_vm12 = vweird.f32 %v134_v9  ;;  %vm152_vm14 = vweird.f32 %v135_v10 }
 0x1ff   :  { %221 = vrsqrt.f32 %v135_v10 }
 0x204   :  { %v220_v11 = vpop.eup %219 }
 0x205   :  { %v222_v12 = vpop.eup %221  ;;  %v137_v13 = vmul.f32 %v220_v11, %v134_v9  ;;  %vm143_vm10 = vweird.f32 %v220_v11 }
 0x206   :  { %v147_v14 = vmul.f32 %v222_v12, %v135_v10  ;;  %vm153_vm11 = vweird.f32 %v222_v12  ;;  %vm144_vm13 = vmor %vm142_vm12, %vm143_vm10 }
 0x207   :  { %v138_v15 = vmul.f32 %v220_v11, %v137_v13  ;;  %vm154_vm15 = vmor %vm152_vm14, %vm153_vm11 }
 0x208   :  { %v148_v16 = vmul.f32 %v222_v12, %v147_v14 }
 0x209   :  { %v139_v17 = vmul.f32 0.5, %v138_v15 }
 0x20a   :  { %v149_v18 = vmul.f32 0.5, %v148_v16 }
 0x20b   :  { %v140_v19 = vsub.f32 1.5, %v139_v17 }
 0x20c   :  { %v150_v20 = vsub.f32 1.5, %v149_v18 }
 0x20d   :  { %v141_v21 = vmul.f32 %v220_v11, %v140_v19 }
 0x20e   :  { %v151_v23 = vmul.f32 %v222_v12, %v150_v20 }
 0x20f   :  { %v145_v24 = vsel %vm144_vm13, %v220_v11, %v141_v21 }
 0x210   :  { %v156_v25 = vmul.f32 %v145_v24, %v122_v0  ;;  %v155_v26 = vsel %vm154_vm15, %v222_v12, %v151_v23 }
 0x211   :  { %v157_v28 = vmul.f32 %v155_v26, %v123_v63 }
 0x212   :  { %v161_v29 = vmul.f32 %v215_v22, %v156_v25 }
 0x213   :  { %v162_v30 = vmul.f32 %v215_v22, %v157_v28 }
 0x214   :  { %v164_v31 = vadd.f32 %v216_v27, %v161_v29 }
 0x215   :  { %v165_v32 = vadd.f32 %v216_v27, %v162_v30 }
 0x216   :  { %166 = vst.msk [vmem:[#allocation2] sm:$0xff] %vm106_vm8, %v164_v31 }
 0x217   :  { %167 = vst.msk [vmem:[#allocation2 + $0x8] sm:$0xff] %vm106_vm8, %v165_v32 }
 0x218   :  { %180 = dma.vmem_to_hbm [thread:$0]  %s173_s24, 256, %s175_s0, [#allocation3], %s255_s27, %s255_s27, %s256_s28  }
 0x219   :  { %247 = dma.done.wait [#allocation3], 256  }
 0x21a   :  { %248 = vsyncadd [#allocation3], 4294967040 }
 0x21b   :  { %185 = vsyncpa [#allocation3], 1 }

</bundles_post_ra>
